<compile_context>
chip_gen: v6e
topology: v6e:2x2x1
jax: 0.10.0
libtpu: 0.0.40
codegen_flags: <defaults>
</compile_context>

<pallas_src>
import jax
import jax.numpy as jnp
from jax.experimental import pallas as pl
from jax.experimental.pallas import tpu as pltpu

# Max batch rows per grid step.  Per-row VMEM (double-buffered x and out tiles,
# lane-padded to 128 in VMEM, plus the f32 hidden intermediate) is ~2.5 KB, so
# 4096 rows ~= 10 MiB -- under v5e's 16 MiB scoped-VMEM default and v6e/v7x's
# 32 MiB.  Raise together with CompilerParams(vmem_limit_bytes=...) if you want
# bigger tiles on v6e/v7x (v7x physical VMEM is 64 MiB).
_MAX_TM = 4096


def _mlp_kernel(x_ref, w1_ref, b1_ref, w2_ref, b2_ref, o_ref):
    # fc1: x @ W1 + b1  (f32 accumulation on the MXU).
    h = jnp.dot(x_ref[...], w1_ref[...], preferred_element_type=jnp.float32)
    h = jnp.maximum(h + b1_ref[...], 0.0)            # bias + ReLU on the VPU (f32)
    # fc2: h @ W2 + b2.
    out = jnp.dot(h, w2_ref[...], preferred_element_type=jnp.float32)
    o_ref[...] = (out + b2_ref[...]).astype(o_ref.dtype)


def _pick_tm(batch, block_batch):
    """Batch-tile rows: either tm == batch (single step, any batch size is a
    legal full-extent block) or a multiple of 8 (ragged last block handled by
    the grid)."""
    if block_batch is None:
        return batch if batch <= _MAX_TM else _MAX_TM
    tm = min(block_batch, batch)
    if tm != batch:
        tm = max(8, (tm // 8) * 8)
    return tm


def simple_nn_forward(x, w1, b1, w2, b2, *, block_batch=None):
    """Fused fc1 -> ReLU -> fc2.

    x:  [B, input_size]
    w1: [input_size, hidden]    (PyTorch fc1.weight transposed)
    b1: [hidden] or [1, hidden]
    w2: [hidden, num_classes]   (PyTorch fc2.weight transposed)
    b2: [num_classes] or [1, num_classes]
    returns [B, num_classes]
    """
    B, in_size = x.shape
    hidden = w1.shape[1]
    num_classes = w2.shape[1]
    b1 = b1.reshape(1, hidden)          # accept 1-D or [1, H] biases
    b2 = b2.reshape(1, num_classes)

    tm = _pick_tm(B, block_batch)
    grid = pl.cdiv(B, tm)               # ragged last block masked by Pallas

    cost = pl.CostEstimate(
        flops=2 * B * (in_size * hidden + hidden * num_classes),
        transcendentals=0,
        bytes_accessed=4 * (x.size + w1.size + b1.size + w2.size + b2.size
                            + B * num_classes),
    )

    return pl.pallas_call(
        _mlp_kernel,
        out_shape=jax.ShapeDtypeStruct((B, num_classes), x.dtype),
        grid_spec=pltpu.PrefetchScalarGridSpec(
            num_scalar_prefetch=0,
            grid=(grid,),
            in_specs=[
                # Batch-tiled activations (double-buffered by the pipeline).
                pl.BlockSpec((tm, in_size), lambda i: (i, 0)),
                # Weights/biases: same block every step -> resident in VMEM.
                pl.BlockSpec((in_size, hidden), lambda i: (0, 0)),
                pl.BlockSpec((1, hidden), lambda i: (0, 0)),
                pl.BlockSpec((hidden, num_classes), lambda i: (0, 0)),
                pl.BlockSpec((1, num_classes), lambda i: (0, 0)),
            ],
            out_specs=pl.BlockSpec((tm, num_classes), lambda i: (i, 0)),
        ),
        compiler_params=pltpu.CompilerParams(
            dimension_semantics=("parallel",)),   # shards batch tiles on v7x's 2 TCs
        cost_estimate=cost,
    )(x, w1, b1, w2, b2)


def reference_forward(x, w1, b1, w2, b2):
    h = jnp.maximum(x @ w1 + b1.reshape(1, -1), 0.0)
    return h @ w2 + b2.reshape(1, -1)


if __name__ == "__main__":
    # Shapes implied by the module: hidden=64 is fixed; input_size=32 and
    # num_classes=16 are small constructor choices; batch=512 -> single grid
    # step (the overhead-optimal configuration at this size).
    batch, input_size, hidden, num_classes = 512, 32, 64, 16

    key = jax.random.PRNGKey(0)
    kx, k1, k2, k3, k4 = jax.random.split(key, 5)

    x = jax.random.normal(kx, (batch, input_size), dtype=jnp.float32)

    # PyTorch-style uniform init (bound 1/sqrt(fan_in)), stored as [in, out].
    bound1 = 1.0 / (input_size ** 0.5)
    w1 = jax.random.uniform(k1, (input_size, hidden), jnp.float32, -bound1, bound1)
    b1 = jax.random.uniform(k2, (hidden,), jnp.float32, -bound1, bound1)
    bound2 = 1.0 / (hidden ** 0.5)
    w2 = jax.random.uniform(k3, (hidden, num_classes), jnp.float32, -bound2, bound2)
    b2 = jax.random.uniform(k4, (num_classes,), jnp.float32, -bound2, bound2)

    out = simple_nn_forward(x, w1, b1, w2, b2)
    jax.block_until_ready(out)

    ref = reference_forward(x, w1, b1, w2, b2)
    assert out.shape == (batch, num_classes)
    assert jnp.allclose(out, ref, atol=1e-5, rtol=1e-5)

    print("KERNEL_OK")
</pallas_src>

<mosaic_0001>
module attributes {stable_mosaic.version = 11 : i64} {
  func.func @_mlp_kernel(%arg0: i32, %arg1: memref<512x32xf32, #tpu.memory_space<vmem>>, %arg2: memref<32x64xf32, #tpu.memory_space<vmem>>, %arg3: memref<1x64xf32, #tpu.memory_space<vmem>>, %arg4: memref<64x16xf32, #tpu.memory_space<vmem>>, %arg5: memref<1x16xf32, #tpu.memory_space<vmem>>, %arg6: memref<512x16xf32, #tpu.memory_space<vmem>>) attributes {dimension_semantics = [#tpu.dimension_semantics<parallel>], iteration_bounds = array<i64: 1>, scalar_prefetch = 0 : i64, scratch_operands = 0 : i64, tpu.core_type = #tpu.core_type<tc>, window_params = [{transform_indices = @transform_0, window_bounds = array<i64: 512, 32>}, {pipeline_mode = #tpu.pipeline_mode<synchronous>, transform_indices = @transform_1, window_bounds = array<i64: 32, 64>}, {pipeline_mode = #tpu.pipeline_mode<synchronous>, transform_indices = @transform_2, window_bounds = array<i64: 1, 64>}, {pipeline_mode = #tpu.pipeline_mode<synchronous>, transform_indices = @transform_3, window_bounds = array<i64: 64, 16>}, {pipeline_mode = #tpu.pipeline_mode<synchronous>, transform_indices = @transform_4, window_bounds = array<i64: 1, 16>}, {transform_indices = @transform_5, window_bounds = array<i64: 512, 16>}]} {
    %c0 = arith.constant 0 : index
    %c0_0 = arith.constant 0 : index
    %0 = vector.load %arg1[%c0, %c0_0] : memref<512x32xf32, #tpu.memory_space<vmem>>, vector<512x32xf32>
    %c0_1 = arith.constant 0 : index
    %c0_2 = arith.constant 0 : index
    %1 = vector.load %arg2[%c0_1, %c0_2] : memref<32x64xf32, #tpu.memory_space<vmem>>, vector<32x64xf32>
    %cst = arith.constant dense<0.000000e+00> : vector<512x64xf32>
    %2 = tpu.matmul %0, %1, %cst {dimension_numbers = #tpu.dot_dimension_numbers<[1], [0], [0], [1], [0, 0, 1, 1], [], []>} : vector<512x32xf32>, vector<32x64xf32>, vector<512x64xf32> -> vector<512x64xf32>
    %c0_3 = arith.constant 0 : index
    %c0_4 = arith.constant 0 : index
    %3 = vector.load %arg3[%c0_3, %c0_4] : memref<1x64xf32, #tpu.memory_space<vmem>>, vector<1x64xf32>
    %4 = vector.broadcast %3 : vector<1x64xf32> to vector<512x64xf32>
    %5 = arith.addf %2, %4 : vector<512x64xf32>
    %cst_5 = arith.constant 0.000000e+00 : f32
    %6 = vector.broadcast %cst_5 : f32 to vector<512x64xf32>
    %7 = arith.maximumf %5, %6 : vector<512x64xf32>
    %c0_6 = arith.constant 0 : index
    %c0_7 = arith.constant 0 : index
    %8 = vector.load %arg4[%c0_6, %c0_7] : memref<64x16xf32, #tpu.memory_space<vmem>>, vector<64x16xf32>
    %cst_8 = arith.constant dense<0.000000e+00> : vector<512x16xf32>
    %9 = tpu.matmul %7, %8, %cst_8 {dimension_numbers = #tpu.dot_dimension_numbers<[1], [0], [0], [1], [0, 0, 1, 1], [], []>} : vector<512x64xf32>, vector<64x16xf32>, vector<512x16xf32> -> vector<512x16xf32>
    %c0_9 = arith.constant 0 : index
    %c0_10 = arith.constant 0 : index
    %10 = vector.load %arg5[%c0_9, %c0_10] : memref<1x16xf32, #tpu.memory_space<vmem>>, vector<1x16xf32>
    %11 = vector.broadcast %10 : vector<1x16xf32> to vector<512x16xf32>
    %12 = arith.addf %9, %11 : vector<512x16xf32>
    %c0_11 = arith.constant 0 : index
    %c0_12 = arith.constant 0 : index
    %13 = vector.load %arg6[%c0_11, %c0_12] : memref<512x16xf32, #tpu.memory_space<vmem>>, vector<512x16xf32>
    tpu.vector_store %arg6[%c0_11, %c0_12], %12 {strides = array<i32>} : memref<512x16xf32, #tpu.memory_space<vmem>>, vector<512x16xf32>,
    return
  }
  func.func @transform_0(%arg0: i32) -> (i32, i32) {
    %c0_i32 = arith.constant 0 : i32
    %c0_i32_0 = arith.constant 0 : i32
    return %arg0, %c0_i32 : i32, i32
  }
  func.func @transform_1(%arg0: i32) -> (i32, i32) {
    %c0_i32 = arith.constant 0 : i32
    %c0_i32_0 = arith.constant 0 : i32
    %c0_i32_1 = arith.constant 0 : i32
    return %c0_i32, %c0_i32_0 : i32, i32
  }
  func.func @transform_2(%arg0: i32) -> (i32, i32) {
    %c0_i32 = arith.constant 0 : i32
    %c0_i32_0 = arith.constant 0 : i32
    %c0_i32_1 = arith.constant 0 : i32
    return %c0_i32, %c0_i32_0 : i32, i32
  }
  func.func @transform_3(%arg0: i32) -> (i32, i32) {
    %c0_i32 = arith.constant 0 : i32
    %c0_i32_0 = arith.constant 0 : i32
    %c0_i32_1 = arith.constant 0 : i32
    return %c0_i32, %c0_i32_0 : i32, i32
  }
  func.func @transform_4(%arg0: i32) -> (i32, i32) {
    %c0_i32 = arith.constant 0 : i32
    %c0_i32_0 = arith.constant 0 : i32
    %c0_i32_1 = arith.constant 0 : i32
    return %c0_i32, %c0_i32_0 : i32, i32
  }
  func.func @transform_5(%arg0: i32) -> (i32, i32) {
    %c0_i32 = arith.constant 0 : i32
    %c0_i32_0 = arith.constant 0 : i32
    return %arg0, %c0_i32 : i32, i32
  }
}

</mosaic_0001>

<bundles_post_ra>
// kernel: tpu_custom_call.1
= control target key start
LH: loop header
LB: loop body
LE: loop exit
PB: predicated region body
PF: predicated region fallthrough
CT: control target
= control target key end

     0   :  { %vm95_vm0 = vcmask 261120   ;;  %vm752_vm1 = vcmask 523264   ;;  %vm1330_vm2 = vcmask 130048   ;;  %s2681_s1 = inlined_call_operand.vmem [shape: f32[32,64], index: 1, kind: input, shape index: {}]   ;;  %s2682_s0 = inlined_call_operand.vmem [shape: f32[512,32], index: 0, kind: input, shape index: {}]   ;;  %s2683_s3 = inlined_call_operand.vmem [shape: f32[64,16], index: 3, kind: input, shape index: {}]   ;;  %s2684_s2 = inlined_call_operand.vmem [shape: f32[1,64], index: 2, kind: input, shape index: {}]   ;;  %s2685_s4 = inlined_call_operand.vmem [shape: f32[1,16], index: 4, kind: input, shape index: {}]   ;;  %s2686_s5 = inlined_call_operand.vmem [shape: f32[512,16], index: 5, kind: output, shape index: {}]  }
   0x1   :  { %v87_v0 = vld [vmem:[%s2681_s1 + $0x18] sm:$0xff]  ;;  %v86_v1 = vld [vmem:[%s2681_s1 + $0x10] sm:$0xff]  ;;  %v20_v2 = vld [vmem:[%s2682_s0] sm:$0xff] }
   0x2   :  { %1669 = vmatprep.subr.mxu0 %v87_v0  ;;  %v85_v3 = vld [vmem:[%s2681_s1 + $0x8] sm:$0xff]  ;;  %1677 = vmatprep.mubr.msk.f32.mxu0 %vm95_vm0, %v20_v2  ;;  %v84_v4 = vld [vmem:[%s2681_s1] sm:$0xff]  ;;  %v22_v6 = vld [vmem:[%s2682_s0 + $0x10] sm:$0xff] }
   0x3   :  { %1670 = vmatpush3.msra.mxu0 %v87_v0  ;;  %v21_v5 = vld [vmem:[%s2682_s0 + $0x8] sm:$0xff]  ;;  %v23_v7 = vld [vmem:[%s2682_s0 + $0x18] sm:$0xff]  ;;  %v24_v8 = vld [vmem:[%s2682_s0 + $0x20] sm:$0xff] }
   0x4   :  { %1671 = vmatprep.subr.mxu0 %v86_v1  ;;  %v25_v9 = vld [vmem:[%s2682_s0 + $0x28] sm:$0xff]  ;;  %v26_v10 = vld [vmem:[%s2682_s0 + $0x30] sm:$0xff]  ;;  %v27_v11 = vld [vmem:[%s2682_s0 + $0x38] sm:$0xff] }
   0x5   :  { %1672 = vmatpush3.msra.mxu0 %v86_v1  ;;  %v28_v12 = vld [vmem:[%s2682_s0 + $0x40] sm:$0xff]  ;;  %v29_v13 = vld [vmem:[%s2682_s0 + $0x48] sm:$0xff]  ;;  %v744_v14 = vld [vmem:[%s2683_s3 + $0x38] sm:$0xff] }
   0x6   :  { %1673 = vmatprep.subr.mxu0 %v85_v3  ;;  %v30_v15 = vld [vmem:[%s2682_s0 + $0x50] sm:$0xff]  ;;  %1885 = vmatprep.subr.mxu1 %v744_v14  ;;  %v742_v17 = vld [vmem:[%s2683_s3 + $0x28] sm:$0xff]  ;;  %v31_v18 = vld [vmem:[%s2682_s0 + $0x58] sm:$0xff] }
   0x7   :  { %1674 = vmatpush3.msra.mxu0 %v85_v3  ;;  %v743_v16 = vld [vmem:[%s2683_s3 + $0x30] sm:$0xff]  ;;  %1893 = vmatpush3.msra.mxu1 %v744_v14  ;;  %v741_v19 = vld [vmem:[%s2683_s3 + $0x20] sm:$0xff]  ;;  %v33_v21 = vld [vmem:[%s2682_s0 + $0x68] sm:$0xff] }
   0x8   :  { %1675 = vmatprep.subr.mxu0 %v84_v4  ;;  %v32_v20 = vld [vmem:[%s2682_s0 + $0x60] sm:$0xff]  ;;  %1886 = vmatprep.subr.mxu1 %v743_v16  ;;  %v34_v22 = vld [vmem:[%s2682_s0 + $0x70] sm:$0xff]  ;;  %v35_v23 = vld [vmem:[%s2682_s0 + $0x78] sm:$0xff] }
   0x9   :  { %1676 = vmatpush3.msra.mxu0 %v84_v4  ;;  %1894 = vmatpush3.msra.mxu1 %v743_v16  ;;  %v36_v24 = vld [vmem:[%s2682_s0 + $0x80] sm:$0xff]  ;;  %v37_v25 = vld [vmem:[%s2682_s0 + $0x88] sm:$0xff]  ;;  %v38_v26 = vld [vmem:[%s2682_s0 + $0x90] sm:$0xff] }
   0xa   :  { %1678 = vmatmul.mubr.msk.f32.vlgmr.msra.gmra.mxu0 %vm95_vm0, %v21_v5  ;;  %1773 = vmatprep.subr.mxu0 %v744_v14  ;;  %v39_v27 = vld [vmem:[%s2682_s0 + $0x98] sm:$0xff]  ;;  %v40_v28 = vld [vmem:[%s2682_s0 + $0xa0] sm:$0xff]  ;;  %v41_v29 = vld [vmem:[%s2682_s0 + $0xa8] sm:$0xff] }
   0xb   :  { %1680 = vmatprep.mubr.msk.f32.mxu0 %vm95_vm0, %v22_v6  ;;  %1774 = vmatpush3.msra.mxu0 %v744_v14  ;;  %v42_v30 = vld [vmem:[%s2682_s0 + $0xb0] sm:$0xff]  ;;  %v43_v31 = vld [vmem:[%s2682_s0 + $0xb8] sm:$0xff]  ;;  %v44_v32 = vld [vmem:[%s2682_s0 + $0xc0] sm:$0xff] }
   0xc   :  { %1775 = vmatprep.subr.mxu0 %v743_v16  ;;  %1887 = vmatprep.subr.mxu1 %v742_v17  ;;  %v45_v33 = vld [vmem:[%s2682_s0 + $0xc8] sm:$0xff]  ;;  %v46_v34 = vld [vmem:[%s2682_s0 + $0xd0] sm:$0xff]  ;;  %v47_v35 = vld [vmem:[%s2682_s0 + $0xd8] sm:$0xff] }
   0xd   :  { %1776 = vmatpush3.msra.mxu0 %v743_v16  ;;  %1895 = vmatpush3.msra.mxu1 %v742_v17  ;;  %v48_v36 = vld [vmem:[%s2682_s0 + $0xe0] sm:$0xff]  ;;  %v49_v37 = vld [vmem:[%s2682_s0 + $0xe8] sm:$0xff]  ;;  %v50_v38 = vld [vmem:[%s2682_s0 + $0xf0] sm:$0xff] }
   0xe   :  { %1681 = vmatmul.mubr.msk.f32.gmra.mxu0 %vm95_vm0, %v23_v7  ;;  %1777 = vmatprep.subr.mxu0 %v742_v17  ;;  %v51_v39 = vld [vmem:[%s2682_s0 + $0xf8] sm:$0xff]  ;;  %v52_v40 = vld [vmem:[%s2682_s0 + $0x100] sm:$0xff]  ;;  %v53_v41 = vld [vmem:[%s2682_s0 + $0x108] sm:$0xff] }
   0xf   :  { %1683 = vmatprep.mubr.msk.f32.mxu0 %vm95_vm0, %v24_v8  ;;  %1778 = vmatpush3.msra.mxu0 %v742_v17  ;;  %v54_v42 = vld [vmem:[%s2682_s0 + $0x110] sm:$0xff]  ;;  %v740_v43 = vld [vmem:[%s2683_s3 + $0x18] sm:$0xff]  ;;  %v56_v46 = vld [vmem:[%s2682_s0 + $0x120] sm:$0xff] }
  0x10   :  { %1779 = vmatprep.subr.mxu0 %v741_v19  ;;  %1888 = vmatprep.subr.mxu1 %v741_v19  ;;  %v55_v44 = vld [vmem:[%s2682_s0 + $0x118] sm:$0xff]  ;;  %v739_v45 = vld [vmem:[%s2683_s3 + $0x10] sm:$0xff]  ;;  %v738_v47 = vld [vmem:[%s2683_s3 + $0x8] sm:$0xff] }
  0x11   :  { %1780 = vmatpush3.msra.mxu0 %v741_v19  ;;  %1896 = vmatpush3.msra.mxu1 %v741_v19  ;;  %v57_v48 = vld [vmem:[%s2682_s0 + $0x128] sm:$0xff]  ;;  %v737_v49 = vld [vmem:[%s2683_s3] sm:$0xff]  ;;  %v58_v50 = vld [vmem:[%s2682_s0 + $0x130] sm:$0xff] }
  0x12   :  { %1684 = vmatmul.mubr.msk.f32.gmra.mxu0 %vm95_vm0, %v25_v9  ;;  %1781 = vmatprep.subr.mxu0 %v740_v43  ;;  %v59_v51 = vld [vmem:[%s2682_s0 + $0x138] sm:$0xff]  ;;  %v60_v52 = vld [vmem:[%s2682_s0 + $0x140] sm:$0xff]  ;;  %v61_v53 = vld [vmem:[%s2682_s0 + $0x148] sm:$0xff] }
  0x13   :  { %1686 = vmatprep.mubr.msk.f32.mxu0 %vm95_vm0, %v26_v10  ;;  %1782 = vmatpush3.msra.mxu0 %v740_v43  ;;  %v62_v54 = vld [vmem:[%s2682_s0 + $0x150] sm:$0xff]  ;;  %v63_v55 = vld [vmem:[%s2682_s0 + $0x158] sm:$0xff]  ;;  %v64_v56 = vld [vmem:[%s2682_s0 + $0x160] sm:$0xff] }
  0x14   :  { %1783 = vmatprep.subr.mxu0 %v739_v45  ;;  %1889 = vmatprep.subr.mxu1 %v740_v43  ;;  %v65_v57 = vld [vmem:[%s2682_s0 + $0x168] sm:$0xff]  ;;  %v66_v58 = vld [vmem:[%s2682_s0 + $0x170] sm:$0xff]  ;;  %v67_v59 = vld [vmem:[%s2682_s0 + $0x178] sm:$0xff] }
  0x15   :  { %1784 = vmatpush3.msra.mxu0 %v739_v45  ;;  %1897 = vmatpush3.msra.mxu1 %v740_v43  ;;  %v68_v60 = vld [vmem:[%s2682_s0 + $0x180] sm:$0xff]  ;;  %v69_v61 = vld [vmem:[%s2682_s0 + $0x188] sm:$0xff]  ;;  %v70_v62 = vld [vmem:[%s2682_s0 + $0x190] sm:$0xff] }
  0x16   :  { %1687 = vmatmul.mubr.msk.f32.gmra.mxu0 %vm95_vm0, %v27_v11  ;;  %1785 = vmatprep.subr.mxu0 %v738_v47  ;;  %v71_v63 = vld [vmem:[%s2682_s0 + $0x198] sm:$0xff]  ;;  %v72_v0 = vld [vmem:[%s2682_s0 + $0x1a0] sm:$0xff]  ;;  %v73_v1 = vld [vmem:[%s2682_s0 + $0x1a8] sm:$0xff] }
  0x17   :  { %1689 = vmatprep.mubr.msk.f32.mxu0 %vm95_vm0, %v28_v12  ;;  %1786 = vmatpush3.msra.mxu0 %v738_v47  ;;  %v74_v2 = vld [vmem:[%s2682_s0 + $0x1b0] sm:$0xff]  ;;  %v75_v3 = vld [vmem:[%s2682_s0 + $0x1b8] sm:$0xff]  ;;  %v76_v4 = vld [vmem:[%s2682_s0 + $0x1c0] sm:$0xff] }
  0x18   :  { %1890 = vmatprep.subr.mxu1 %v739_v45  ;;  %1787 = vmatprep.subr.mxu0 %v737_v49  ;;  %v77_v5 = vld [vmem:[%s2682_s0 + $0x1c8] sm:$0xff]  ;;  %v78_v6 = vld [vmem:[%s2682_s0 + $0x1d0] sm:$0xff]  ;;  %v79_v7 = vld [vmem:[%s2682_s0 + $0x1d8] sm:$0xff] }
  0x19   :  { %1898 = vmatpush3.msra.mxu1 %v739_v45  ;;  %1788 = vmatpush3.msra.mxu0 %v737_v49  ;;  %v80_v8 = vld [vmem:[%s2682_s0 + $0x1e0] sm:$0xff]  ;;  %v81_v9 = vld [vmem:[%s2682_s0 + $0x1e8] sm:$0xff]  ;;  %v82_v10 = vld [vmem:[%s2682_s0 + $0x1f0] sm:$0xff] }
  0x1a   :  { %1690 = vmatmul.mubr.msk.f32.gmra.mxu0 %vm95_vm0, %v29_v13  ;;  %1891 = vmatprep.subr.mxu1 %v738_v47  ;;  %v83_v11 = vld [vmem:[%s2682_s0 + $0x1f8] sm:$0xff]  ;;  %v2226_v12 = vld [vmem:[%s2684_s2] ss:$0 sm:$0xff] }
  0x1b   :  { %1692 = vmatprep.mubr.msk.f32.mxu0 %vm95_vm0, %v30_v15  ;;  %1899 = vmatpush3.msra.mxu1 %v738_v47 }
  0x1c   :  { %1892 = vmatprep.subr.mxu1 %v737_v49 }
  0x1d   :  { %1900 = vmatpush3.msra.mxu1 %v737_v49 }
  0x1e   :  { %1693 = vmatmul.mubr.msk.f32.gmra.mxu0 %vm95_vm0, %v31_v18 }
  0x1f   :  { %1695 = vmatprep.mubr.msk.f32.mxu0 %vm95_vm0, %v32_v20 }
  0x22   :  { %1696 = vmatmul.mubr.msk.f32.gmra.mxu0 %vm95_vm0, %v33_v21 }
  0x23   :  { %1698 = vmatprep.mubr.msk.f32.mxu0 %vm95_vm0, %v34_v22 }
  0x26   :  { %1699 = vmatmul.mubr.msk.f32.gmra.mxu0 %vm95_vm0, %v35_v23 }
  0x27   :  { %1701 = vmatprep.mubr.msk.f32.mxu0 %vm95_vm0, %v36_v24 }
  0x2a   :  { %1702 = vmatmul.mubr.msk.f32.gmra.mxu0 %vm95_vm0, %v37_v25 }
  0x2b   :  { %1704 = vmatprep.mubr.msk.f32.mxu0 %vm95_vm0, %v38_v26 }
  0x2e   :  { %1705 = vmatmul.mubr.msk.f32.gmra.mxu0 %vm95_vm0, %v39_v27 }
  0x2f   :  { %1707 = vmatprep.mubr.msk.f32.mxu0 %vm95_vm0, %v40_v28 }
  0x32   :  { %1708 = vmatmul.mubr.msk.f32.gmra.mxu0 %vm95_vm0, %v41_v29 }
  0x33   :  { %1710 = vmatprep.mubr.msk.f32.mxu0 %vm95_vm0, %v42_v30 }
  0x36   :  { %1711 = vmatmul.mubr.msk.f32.gmra.mxu0 %vm95_vm0, %v43_v31 }
  0x37   :  { %1713 = vmatprep.mubr.msk.f32.mxu0 %vm95_vm0, %v44_v32 }
  0x3a   :  { %1714 = vmatmul.mubr.msk.f32.gmra.mxu0 %vm95_vm0, %v45_v33 }
  0x3b   :  { %1716 = vmatprep.mubr.msk.f32.mxu0 %vm95_vm0, %v46_v34 }
  0x3e   :  { %1717 = vmatmul.mubr.msk.f32.gmra.mxu0 %vm95_vm0, %v47_v35 }
  0x3f   :  { %1719 = vmatprep.mubr.msk.f32.mxu0 %vm95_vm0, %v48_v36 }
  0x42   :  { %1720 = vmatmul.mubr.msk.f32.gmra.mxu0 %vm95_vm0, %v49_v37 }
  0x43   :  { %1722 = vmatprep.mubr.msk.f32.mxu0 %vm95_vm0, %v50_v38 }
  0x46   :  { %1723 = vmatmul.mubr.msk.f32.gmra.mxu0 %vm95_vm0, %v51_v39 }
  0x47   :  { %1725 = vmatprep.mubr.msk.f32.mxu0 %vm95_vm0, %v52_v40 }
  0x4a   :  { %1726 = vmatmul.mubr.msk.f32.gmra.mxu0 %vm95_vm0, %v53_v41 }
  0x4b   :  { %1728 = vmatprep.mubr.msk.f32.mxu0 %vm95_vm0, %v54_v42 }
  0x4e   :  { %1729 = vmatmul.mubr.msk.f32.gmra.mxu0 %vm95_vm0, %v55_v44 }
  0x4f   :  { %1731 = vmatprep.mubr.msk.f32.mxu0 %vm95_vm0, %v56_v46 }
  0x52   :  { %1732 = vmatmul.mubr.msk.f32.gmra.mxu0 %vm95_vm0, %v57_v48 }
  0x53   :  { %1734 = vmatprep.mubr.msk.f32.mxu0 %vm95_vm0, %v58_v50 }
  0x56   :  { %1735 = vmatmul.mubr.msk.f32.gmra.mxu0 %vm95_vm0, %v59_v51 }
  0x57   :  { %1737 = vmatprep.mubr.msk.f32.mxu0 %vm95_vm0, %v60_v52 }
  0x5a   :  { %1738 = vmatmul.mubr.msk.f32.gmra.mxu0 %vm95_vm0, %v61_v53 }
  0x5b   :  { %1740 = vmatprep.mubr.msk.f32.mxu0 %vm95_vm0, %v62_v54 }
  0x5e   :  { %1741 = vmatmul.mubr.msk.f32.gmra.mxu0 %vm95_vm0, %v63_v55 }
  0x5f   :  { %1743 = vmatprep.mubr.msk.f32.mxu0 %vm95_vm0, %v64_v56 }
  0x62   :  { %1744 = vmatmul.mubr.msk.f32.gmra.mxu0 %vm95_vm0, %v65_v57 }
  0x63   :  { %1746 = vmatprep.mubr.msk.f32.mxu0 %vm95_vm0, %v66_v58 }
  0x66   :  { %1747 = vmatmul.mubr.msk.f32.gmra.mxu0 %vm95_vm0, %v67_v59 }
  0x67   :  { %1749 = vmatprep.mubr.msk.f32.mxu0 %vm95_vm0, %v68_v60 }
  0x6a   :  { %1750 = vmatmul.mubr.msk.f32.gmra.mxu0 %vm95_vm0, %v69_v61 }
  0x6b   :  { %1752 = vmatprep.mubr.msk.f32.mxu0 %vm95_vm0, %v70_v62 }
  0x6e   :  { %1753 = vmatmul.mubr.msk.f32.gmra.mxu0 %vm95_vm0, %v71_v63 }
  0x6f   :  { %1755 = vmatprep.mubr.msk.f32.mxu0 %vm95_vm0, %v72_v0 }
  0x72   :  { %1756 = vmatmul.mubr.msk.f32.gmra.mxu0 %vm95_vm0, %v73_v1 }
  0x73   :  { %1758 = vmatprep.mubr.msk.f32.mxu0 %vm95_vm0, %v74_v2 }
  0x76   :  { %1759 = vmatmul.mubr.msk.f32.gmra.mxu0 %vm95_vm0, %v75_v3 }
  0x77   :  { %1761 = vmatprep.mubr.msk.f32.mxu0 %vm95_vm0, %v76_v4 }
  0x7a   :  { %1762 = vmatmul.mubr.msk.f32.gmra.mxu0 %vm95_vm0, %v77_v5 }
  0x7b   :  { %1764 = vmatprep.mubr.msk.f32.mxu0 %vm95_vm0, %v78_v6 }
  0x7e   :  { %1765 = vmatmul.mubr.msk.f32.gmra.mxu0 %vm95_vm0, %v79_v7 }
  0x7f   :  { %1767 = vmatprep.mubr.msk.f32.mxu0 %vm95_vm0, %v80_v8 }
  0x82   :  { %1768 = vmatmul.mubr.msk.f32.gmra.mxu0 %vm95_vm0, %v81_v9 }
  0x83   :  { %1770 = vmatprep.mubr.msk.f32.mxu0 %vm95_vm0, %v82_v10 }
  0x86   :  { %1771 = vmatmul.mubr.msk.f32.gmra.mxu0 %vm95_vm0, %v83_v11 }
  0xca   :  { %v1679_v13 = vpop.f32.mrf.mxu0 }
  0xcb   :  { %v360_v14 = vadd.f32 %v1679_v13, %v2226_v12 }
  0xcc   :  { %v354_v15 = vpop.f32.mrf.mxu0 }
  0xcd   :  { %v355_v16 = vadd.f32 %v2226_v12, %v354_v15  ;;  %v674_v19 = vmax.f32 %v360_v14, 0.0 }
  0xce   :  { %v1682_v17 = vpop.f32.mrf.mxu0 }
  0xcf   :  { %v673_v18 = vmax.f32 %v355_v16, 0.0  ;;  %v370_v20 = vadd.f32 %v1682_v17, %v2226_v12 }
  0xd0   :  { %v364_v21 = vpop.f32.mrf.mxu0 }
  0xd1   :  { %v365_v22 = vadd.f32 %v2226_v12, %v364_v21  ;;  %1789 = vmatprep.mubr.msk.f32.mxu0 %vm752_vm1, %v673_v18  ;;  %v676_v25 = vmax.f32 %v370_v20, 0.0 }
  0xd2   :  { %v1685_v23 = vpop.f32.mrf.mxu0  ;;  %1790 = vmatmul.mubr.msk.f32.vlgmr.msra.gmra.mxu0 %vm752_vm1, %v674_v19 }
  0xd3   :  { %v675_v24 = vmax.f32 %v365_v22, 0.0  ;;  %v380_v26 = vadd.f32 %v1685_v23, %v2226_v12 }
  0xd4   :  { %v374_v27 = vpop.f32.mrf.mxu0 }
  0xd5   :  { %v375_v28 = vadd.f32 %v2226_v12, %v374_v27  ;;  %1792 = vmatprep.mubr.msk.f32.mxu1 %vm752_vm1, %v675_v24  ;;  %v678_v31 = vmax.f32 %v380_v26, 0.0 }
  0xd6   :  { %v1688_v29 = vpop.f32.mrf.mxu0  ;;  %1793 = vmatmul.mubr.msk.f32.vlgmr.msra.gmra.mxu1 %vm752_vm1, %v676_v25 }
  0xd7   :  { %v677_v30 = vmax.f32 %v375_v28, 0.0  ;;  %v390_v32 = vadd.f32 %v1688_v29, %v2226_v12 }
  0xd8   :  { %v384_v33 = vpop.f32.mrf.mxu0 }
  0xd9   :  { %v385_v34 = vadd.f32 %v2226_v12, %v384_v33  ;;  %1795 = vmatprep.mubr.msk.f32.mxu1 %vm752_vm1, %v677_v30  ;;  %v680_v37 = vmax.f32 %v390_v32, 0.0 }
  0xda   :  { %v1691_v35 = vpop.f32.mrf.mxu0  ;;  %1796 = vmatmul.mubr.msk.f32.gmra.mxu1 %vm752_vm1, %v678_v31 }
  0xdb   :  { %v679_v36 = vmax.f32 %v385_v34, 0.0  ;;  %v400_v38 = vadd.f32 %v1691_v35, %v2226_v12 }
  0xdc   :  { %v394_v39 = vpop.f32.mrf.mxu0 }
  0xdd   :  { %v395_v40 = vadd.f32 %v2226_v12, %v394_v39  ;;  %1798 = vmatprep.mubr.msk.f32.mxu1 %vm752_vm1, %v679_v36  ;;  %v682_v43 = vmax.f32 %v400_v38, 0.0 }
  0xde   :  { %v1694_v41 = vpop.f32.mrf.mxu0  ;;  %1799 = vmatmul.mubr.msk.f32.gmra.mxu1 %vm752_vm1, %v680_v37 }
  0xdf   :  { %v681_v42 = vmax.f32 %v395_v40, 0.0  ;;  %v410_v44 = vadd.f32 %v1694_v41, %v2226_v12 }
  0xe0   :  { %v404_v45 = vpop.f32.mrf.mxu0 }
  0xe1   :  { %v405_v46 = vadd.f32 %v2226_v12, %v404_v45  ;;  %1801 = vmatprep.mubr.msk.f32.mxu1 %vm752_vm1, %v681_v42  ;;  %v684_v49 = vmax.f32 %v410_v44, 0.0 }
  0xe2   :  { %v1697_v47 = vpop.f32.mrf.mxu0  ;;  %1802 = vmatmul.mubr.msk.f32.gmra.mxu1 %vm752_vm1, %v682_v43 }
  0xe3   :  { %v683_v48 = vmax.f32 %v405_v46, 0.0  ;;  %v420_v50 = vadd.f32 %v1697_v47, %v2226_v12 }
  0xe4   :  { %v414_v51 = vpop.f32.mrf.mxu0 }
  0xe5   :  { %v415_v52 = vadd.f32 %v2226_v12, %v414_v51  ;;  %1804 = vmatprep.mubr.msk.f32.mxu1 %vm752_vm1, %v683_v48  ;;  %v686_v55 = vmax.f32 %v420_v50, 0.0 }
  0xe6   :  { %v1700_v53 = vpop.f32.mrf.mxu0  ;;  %1805 = vmatmul.mubr.msk.f32.gmra.mxu1 %vm752_vm1, %v684_v49 }
  0xe7   :  { %v685_v54 = vmax.f32 %v415_v52, 0.0  ;;  %v430_v56 = vadd.f32 %v1700_v53, %v2226_v12 }
  0xe8   :  { %v424_v57 = vpop.f32.mrf.mxu0 }
  0xe9   :  { %v425_v58 = vadd.f32 %v2226_v12, %v424_v57  ;;  %1807 = vmatprep.mubr.msk.f32.mxu1 %vm752_vm1, %v685_v54  ;;  %v688_v61 = vmax.f32 %v430_v56, 0.0 }
  0xea   :  { %v1703_v59 = vpop.f32.mrf.mxu0  ;;  %1808 = vmatmul.mubr.msk.f32.gmra.mxu1 %vm752_vm1, %v686_v55 }
  0xeb   :  { %v687_v60 = vmax.f32 %v425_v58, 0.0  ;;  %v440_v62 = vadd.f32 %v1703_v59, %v2226_v12 }
  0xec   :  { %v434_v63 = vpop.f32.mrf.mxu0 }
  0xed   :  { %v435_v0 = vadd.f32 %v2226_v12, %v434_v63  ;;  %1810 = vmatprep.mubr.msk.f32.mxu1 %vm752_vm1, %v687_v60  ;;  %v690_v3 = vmax.f32 %v440_v62, 0.0 }
  0xee   :  { %v1706_v1 = vpop.f32.mrf.mxu0  ;;  %1811 = vmatmul.mubr.msk.f32.gmra.mxu1 %vm752_vm1, %v688_v61 }
  0xef   :  { %v689_v2 = vmax.f32 %v435_v0, 0.0  ;;  %v450_v4 = vadd.f32 %v1706_v1, %v2226_v12 }
  0xf0   :  { %v444_v5 = vpop.f32.mrf.mxu0 }
  0xf1   :  { %v445_v6 = vadd.f32 %v2226_v12, %v444_v5  ;;  %1813 = vmatprep.mubr.msk.f32.mxu1 %vm752_vm1, %v689_v2  ;;  %v692_v9 = vmax.f32 %v450_v4, 0.0 }
  0xf2   :  { %v1709_v7 = vpop.f32.mrf.mxu0  ;;  %1814 = vmatmul.mubr.msk.f32.gmra.mxu1 %vm752_vm1, %v690_v3 }
  0xf3   :  { %v691_v8 = vmax.f32 %v445_v6, 0.0  ;;  %v460_v10 = vadd.f32 %v1709_v7, %v2226_v12 }
  0xf4   :  { %v454_v11 = vpop.f32.mrf.mxu0 }
  0xf5   :  { %v455_v13 = vadd.f32 %v2226_v12, %v454_v11  ;;  %1816 = vmatprep.mubr.msk.f32.mxu1 %vm752_vm1, %v691_v8  ;;  %v694_v16 = vmax.f32 %v460_v10, 0.0 }
  0xf6   :  { %v1712_v14 = vpop.f32.mrf.mxu0  ;;  %1817 = vmatmul.mubr.msk.f32.gmra.mxu1 %vm752_vm1, %v692_v9 }
  0xf7   :  { %v693_v15 = vmax.f32 %v455_v13, 0.0  ;;  %v470_v17 = vadd.f32 %v1712_v14, %v2226_v12 }
  0xf8   :  { %v464_v18 = vpop.f32.mrf.mxu0 }
  0xf9   :  { %v465_v19 = vadd.f32 %v2226_v12, %v464_v18  ;;  %1819 = vmatprep.mubr.msk.f32.mxu1 %vm752_vm1, %v693_v15  ;;  %v696_v22 = vmax.f32 %v470_v17, 0.0 }
  0xfa   :  { %v1715_v20 = vpop.f32.mrf.mxu0  ;;  %1820 = vmatmul.mubr.msk.f32.gmra.mxu1 %vm752_vm1, %v694_v16 }
  0xfb   :  { %v695_v21 = vmax.f32 %v465_v19, 0.0  ;;  %v480_v23 = vadd.f32 %v1715_v20, %v2226_v12 }
  0xfc   :  { %v474_v24 = vpop.f32.mrf.mxu0 }
  0xfd   :  { %v475_v25 = vadd.f32 %v2226_v12, %v474_v24  ;;  %1822 = vmatprep.mubr.msk.f32.mxu1 %vm752_vm1, %v695_v21  ;;  %v698_v28 = vmax.f32 %v480_v23, 0.0 }
  0xfe   :  { %v1718_v26 = vpop.f32.mrf.mxu0  ;;  %1823 = vmatmul.mubr.msk.f32.gmra.mxu1 %vm752_vm1, %v696_v22 }
  0xff   :  { %v697_v27 = vmax.f32 %v475_v25, 0.0  ;;  %v490_v29 = vadd.f32 %v1718_v26, %v2226_v12 }
 0x100   :  { %v484_v30 = vpop.f32.mrf.mxu0 }
 0x101   :  { %v485_v31 = vadd.f32 %v2226_v12, %v484_v30  ;;  %1825 = vmatprep.mubr.msk.f32.mxu1 %vm752_vm1, %v697_v27  ;;  %v700_v34 = vmax.f32 %v490_v29, 0.0 }
 0x102   :  { %v1721_v32 = vpop.f32.mrf.mxu0  ;;  %1826 = vmatmul.mubr.msk.f32.gmra.mxu1 %vm752_vm1, %v698_v28 }
 0x103   :  { %v699_v33 = vmax.f32 %v485_v31, 0.0  ;;  %v500_v35 = vadd.f32 %v1721_v32, %v2226_v12 }
 0x104   :  { %v494_v36 = vpop.f32.mrf.mxu0 }
 0x105   :  { %v495_v37 = vadd.f32 %v2226_v12, %v494_v36  ;;  %1828 = vmatprep.mubr.msk.f32.mxu1 %vm752_vm1, %v699_v33  ;;  %v702_v40 = vmax.f32 %v500_v35, 0.0 }
 0x106   :  { %v1724_v38 = vpop.f32.mrf.mxu0  ;;  %1829 = vmatmul.mubr.msk.f32.gmra.mxu1 %vm752_vm1, %v700_v34 }
 0x107   :  { %v701_v39 = vmax.f32 %v495_v37, 0.0  ;;  %v510_v41 = vadd.f32 %v1724_v38, %v2226_v12 }
 0x108   :  { %v504_v42 = vpop.f32.mrf.mxu0 }
 0x109   :  { %v505_v43 = vadd.f32 %v2226_v12, %v504_v42  ;;  %1831 = vmatprep.mubr.msk.f32.mxu1 %vm752_vm1, %v701_v39  ;;  %v704_v46 = vmax.f32 %v510_v41, 0.0 }
 0x10a   :  { %v1727_v44 = vpop.f32.mrf.mxu0  ;;  %1832 = vmatmul.mubr.msk.f32.gmra.mxu1 %vm752_vm1, %v702_v40 }
 0x10b   :  { %v703_v45 = vmax.f32 %v505_v43, 0.0  ;;  %v520_v47 = vadd.f32 %v1727_v44, %v2226_v12 }
 0x10c   :  { %v514_v48 = vpop.f32.mrf.mxu0 }
 0x10d   :  { %v515_v49 = vadd.f32 %v2226_v12, %v514_v48  ;;  %1834 = vmatprep.mubr.msk.f32.mxu1 %vm752_vm1, %v703_v45  ;;  %v706_v52 = vmax.f32 %v520_v47, 0.0 }
 0x10e   :  { %v1730_v50 = vpop.f32.mrf.mxu0  ;;  %1835 = vmatmul.mubr.msk.f32.gmra.mxu1 %vm752_vm1, %v704_v46 }
 0x10f   :  { %v705_v51 = vmax.f32 %v515_v49, 0.0  ;;  %v530_v53 = vadd.f32 %v1730_v50, %v2226_v12 }
 0x110   :  { %v524_v54 = vpop.f32.mrf.mxu0 }
 0x111   :  { %v525_v55 = vadd.f32 %v2226_v12, %v524_v54  ;;  %1837 = vmatprep.mubr.msk.f32.mxu1 %vm752_vm1, %v705_v51  ;;  %v708_v58 = vmax.f32 %v530_v53, 0.0 }
 0x112   :  { %v1733_v56 = vpop.f32.mrf.mxu0  ;;  %1838 = vmatmul.mubr.msk.f32.gmra.mxu1 %vm752_vm1, %v706_v52 }
 0x113   :  { %v707_v57 = vmax.f32 %v525_v55, 0.0  ;;  %v540_v59 = vadd.f32 %v1733_v56, %v2226_v12 }
 0x114   :  { %v534_v60 = vpop.f32.mrf.mxu0 }
 0x115   :  { %v535_v61 = vadd.f32 %v2226_v12, %v534_v60  ;;  %1840 = vmatprep.mubr.msk.f32.mxu1 %vm752_vm1, %v707_v57  ;;  %v710_v0 = vmax.f32 %v540_v59, 0.0 }
 0x116   :  { %v1736_v62 = vpop.f32.mrf.mxu0  ;;  %1841 = vmatmul.mubr.msk.f32.gmra.mxu1 %vm752_vm1, %v708_v58 }
 0x117   :  { %v709_v63 = vmax.f32 %v535_v61, 0.0  ;;  %v550_v1 = vadd.f32 %v1736_v62, %v2226_v12 }
 0x118   :  { %v544_v2 = vpop.f32.mrf.mxu0 }
 0x119   :  { %v545_v3 = vadd.f32 %v2226_v12, %v544_v2  ;;  %1843 = vmatprep.mubr.msk.f32.mxu1 %vm752_vm1, %v709_v63  ;;  %v712_v6 = vmax.f32 %v550_v1, 0.0 }
 0x11a   :  { %v1739_v4 = vpop.f32.mrf.mxu0  ;;  %1844 = vmatmul.mubr.msk.f32.gmra.mxu1 %vm752_vm1, %v710_v0 }
 0x11b   :  { %v711_v5 = vmax.f32 %v545_v3, 0.0  ;;  %v560_v7 = vadd.f32 %v1739_v4, %v2226_v12 }
 0x11c   :  { %v554_v8 = vpop.f32.mrf.mxu0 }
 0x11d   :  { %v555_v9 = vadd.f32 %v2226_v12, %v554_v8  ;;  %1846 = vmatprep.mubr.msk.f32.mxu1 %vm752_vm1, %v711_v5  ;;  %v714_v13 = vmax.f32 %v560_v7, 0.0 }
 0x11e   :  { %v1742_v10 = vpop.f32.mrf.mxu0  ;;  %1847 = vmatmul.mubr.msk.f32.gmra.mxu1 %vm752_vm1, %v712_v6 }
 0x11f   :  { %v713_v11 = vmax.f32 %v555_v9, 0.0  ;;  %v570_v14 = vadd.f32 %v1742_v10, %v2226_v12 }
 0x120   :  { %v564_v15 = vpop.f32.mrf.mxu0 }
 0x121   :  { %v565_v16 = vadd.f32 %v2226_v12, %v564_v15  ;;  %1849 = vmatprep.mubr.msk.f32.mxu1 %vm752_vm1, %v713_v11  ;;  %v716_v19 = vmax.f32 %v570_v14, 0.0 }
 0x122   :  { %v1745_v17 = vpop.f32.mrf.mxu0  ;;  %1850 = vmatmul.mubr.msk.f32.gmra.mxu1 %vm752_vm1, %v714_v13 }
 0x123   :  { %v715_v18 = vmax.f32 %v565_v16, 0.0  ;;  %v580_v20 = vadd.f32 %v1745_v17, %v2226_v12  ;;  %v2359_v16 = vld [vmem:[%s2685_s4] ss:$0 sm:$0xff] }
 0x124   :  { %v574_v21 = vpop.f32.mrf.mxu0 }
 0x125   :  { %v575_v22 = vadd.f32 %v2226_v12, %v574_v21  ;;  %1852 = vmatprep.mubr.msk.f32.mxu1 %vm752_vm1, %v715_v18  ;;  %v718_v25 = vmax.f32 %v580_v20, 0.0 }
 0x126   :  { %v1748_v23 = vpop.f32.mrf.mxu0  ;;  %1853 = vmatmul.mubr.msk.f32.gmra.mxu1 %vm752_vm1, %v716_v19 }
 0x127   :  { %v717_v24 = vmax.f32 %v575_v22, 0.0  ;;  %v590_v26 = vadd.f32 %v1748_v23, %v2226_v12 }
 0x128   :  { %v584_v27 = vpop.f32.mrf.mxu0 }
 0x129   :  { %v585_v28 = vadd.f32 %v2226_v12, %v584_v27  ;;  %1855 = vmatprep.mubr.msk.f32.mxu1 %vm752_vm1, %v717_v24  ;;  %v720_v31 = vmax.f32 %v590_v26, 0.0 }
 0x12a   :  { %v1751_v29 = vpop.f32.mrf.mxu0  ;;  %1856 = vmatmul.mubr.msk.f32.gmra.mxu1 %vm752_vm1, %v718_v25 }
 0x12b   :  { %v719_v30 = vmax.f32 %v585_v28, 0.0  ;;  %v600_v32 = vadd.f32 %v1751_v29, %v2226_v12 }
 0x12c   :  { %v594_v33 = vpop.f32.mrf.mxu0 }
 0x12d   :  { %v595_v34 = vadd.f32 %v2226_v12, %v594_v33  ;;  %1858 = vmatprep.mubr.msk.f32.mxu1 %vm752_vm1, %v719_v30  ;;  %v722_v37 = vmax.f32 %v600_v32, 0.0 }
 0x12e   :  { %v1754_v35 = vpop.f32.mrf.mxu0  ;;  %1859 = vmatmul.mubr.msk.f32.gmra.mxu1 %vm752_vm1, %v720_v31 }
 0x12f   :  { %v721_v36 = vmax.f32 %v595_v34, 0.0  ;;  %v610_v38 = vadd.f32 %v1754_v35, %v2226_v12 }
 0x130   :  { %v604_v39 = vpop.f32.mrf.mxu0 }
 0x131   :  { %v605_v40 = vadd.f32 %v2226_v12, %v604_v39  ;;  %1861 = vmatprep.mubr.msk.f32.mxu1 %vm752_vm1, %v721_v36  ;;  %v724_v43 = vmax.f32 %v610_v38, 0.0 }
 0x132   :  { %v1757_v41 = vpop.f32.mrf.mxu0  ;;  %1862 = vmatmul.mubr.msk.f32.gmra.mxu1 %vm752_vm1, %v722_v37 }
 0x133   :  { %v723_v42 = vmax.f32 %v605_v40, 0.0  ;;  %v620_v44 = vadd.f32 %v1757_v41, %v2226_v12 }
 0x134   :  { %v614_v45 = vpop.f32.mrf.mxu0 }
 0x135   :  { %v615_v46 = vadd.f32 %v2226_v12, %v614_v45  ;;  %1864 = vmatprep.mubr.msk.f32.mxu1 %vm752_vm1, %v723_v42  ;;  %v726_v49 = vmax.f32 %v620_v44, 0.0 }
 0x136   :  { %v1760_v47 = vpop.f32.mrf.mxu0  ;;  %1865 = vmatmul.mubr.msk.f32.gmra.mxu1 %vm752_vm1, %v724_v43 }
 0x137   :  { %v725_v48 = vmax.f32 %v615_v46, 0.0  ;;  %v630_v50 = vadd.f32 %v1760_v47, %v2226_v12 }
 0x138   :  { %v624_v51 = vpop.f32.mrf.mxu0 }
 0x139   :  { %v625_v52 = vadd.f32 %v2226_v12, %v624_v51  ;;  %1867 = vmatprep.mubr.msk.f32.mxu1 %vm752_vm1, %v725_v48  ;;  %v728_v55 = vmax.f32 %v630_v50, 0.0 }
 0x13a   :  { %v1763_v53 = vpop.f32.mrf.mxu0  ;;  %1868 = vmatmul.mubr.msk.f32.gmra.mxu1 %vm752_vm1, %v726_v49 }
 0x13b   :  { %v727_v54 = vmax.f32 %v625_v52, 0.0  ;;  %v640_v56 = vadd.f32 %v1763_v53, %v2226_v12 }
 0x13c   :  { %v634_v57 = vpop.f32.mrf.mxu0 }
 0x13d   :  { %v635_v58 = vadd.f32 %v2226_v12, %v634_v57  ;;  %1870 = vmatprep.mubr.msk.f32.mxu1 %vm752_vm1, %v727_v54  ;;  %v730_v61 = vmax.f32 %v640_v56, 0.0 }
 0x13e   :  { %v1766_v59 = vpop.f32.mrf.mxu0  ;;  %1871 = vmatmul.mubr.msk.f32.gmra.mxu1 %vm752_vm1, %v728_v55 }
 0x13f   :  { %v729_v60 = vmax.f32 %v635_v58, 0.0  ;;  %v650_v62 = vadd.f32 %v1766_v59, %v2226_v12 }
 0x140   :  { %v644_v63 = vpop.f32.mrf.mxu0 }
 0x141   :  { %v645_v0 = vadd.f32 %v2226_v12, %v644_v63  ;;  %1873 = vmatprep.mubr.msk.f32.mxu1 %vm752_vm1, %v729_v60  ;;  %v732_v3 = vmax.f32 %v650_v62, 0.0 }
 0x142   :  { %v1769_v1 = vpop.f32.mrf.mxu0  ;;  %1874 = vmatmul.mubr.msk.f32.gmra.mxu1 %vm752_vm1, %v730_v61 }
 0x143   :  { %v731_v2 = vmax.f32 %v645_v0, 0.0  ;;  %v660_v4 = vadd.f32 %v1769_v1, %v2226_v12 }
 0x144   :  { %v654_v5 = vpop.f32.mrf.mxu0 }
 0x145   :  { %v655_v6 = vadd.f32 %v2226_v12, %v654_v5  ;;  %1876 = vmatprep.mubr.msk.f32.mxu1 %vm752_vm1, %v731_v2  ;;  %v734_v9 = vmax.f32 %v660_v4, 0.0 }
 0x146   :  { %v1772_v7 = vpop.f32.mrf.mxu0  ;;  %1877 = vmatmul.mubr.msk.f32.gmra.mxu1 %vm752_vm1, %v732_v3 }
 0x147   :  { %v733_v8 = vmax.f32 %v655_v6, 0.0  ;;  %v670_v10 = vadd.f32 %v1772_v7, %v2226_v12 }
 0x148   :  { %v664_v11 = vpop.f32.mrf.mxu0 }
 0x149   :  { %v665_v13 = vadd.f32 %v2226_v12, %v664_v11  ;;  %1879 = vmatprep.mubr.msk.f32.mxu1 %vm752_vm1, %v733_v8  ;;  %v736_v15 = vmax.f32 %v670_v10, 0.0 }
 0x14a   :  { %1880 = vmatmul.mubr.msk.f32.gmra.mxu1 %vm752_vm1, %v734_v9 }
 0x14b   :  { %v735_v14 = vmax.f32 %v665_v13, 0.0 }
 0x14d   :  { %1882 = vmatprep.mubr.msk.f32.mxu1 %vm752_vm1, %v735_v14 }
 0x14e   :  { %1883 = vmatmul.mubr.msk.f32.gmra.mxu1 %vm752_vm1, %v736_v15 }
 0x192   :  { %v1791_v17 = vpop.f32.mrf.mxu0 }
 0x193   :  { %v1017_v18 = vadd.f32 %v1791_v17, %v2359_v16 }
 0x194   :  { %v1011_v12 = vpop.f32.mrf.mxu0 }
 0x195   :  { %1332 = vst.msk [vmem:[%s2686_s5 + $0x8] sm:$0xff] %vm1330_vm2, %v1017_v18  ;;  %v1012_v19 = vadd.f32 %v2359_v16, %v1011_v12 }
 0x196   :  { %v1794_v20 = vpop.f32.mrf.mxu1 }
 0x197   :  { %1331 = vst.msk [vmem:[%s2686_s5] sm:$0xff] %vm1330_vm2, %v1012_v19  ;;  %v1027_v21 = vadd.f32 %v1794_v20, %v2359_v16 }
 0x198   :  { %v1021_v22 = vpop.f32.mrf.mxu1 }
 0x199   :  { %1334 = vst.msk [vmem:[%s2686_s5 + $0x18] sm:$0xff] %vm1330_vm2, %v1027_v21  ;;  %v1022_v23 = vadd.f32 %v2359_v16, %v1021_v22 }
 0x19a   :  { %v1797_v24 = vpop.f32.mrf.mxu1 }
 0x19b   :  { %1333 = vst.msk [vmem:[%s2686_s5 + $0x10] sm:$0xff] %vm1330_vm2, %v1022_v23  ;;  %v1037_v25 = vadd.f32 %v1797_v24, %v2359_v16 }
 0x19c   :  { %v1031_v26 = vpop.f32.mrf.mxu1 }
 0x19d   :  { %1336 = vst.msk [vmem:[%s2686_s5 + $0x28] sm:$0xff] %vm1330_vm2, %v1037_v25  ;;  %v1032_v27 = vadd.f32 %v2359_v16, %v1031_v26 }
 0x19e   :  { %v1800_v28 = vpop.f32.mrf.mxu1 }
 0x19f   :  { %1335 = vst.msk [vmem:[%s2686_s5 + $0x20] sm:$0xff] %vm1330_vm2, %v1032_v27  ;;  %v1047_v29 = vadd.f32 %v1800_v28, %v2359_v16 }
 0x1a0   :  { %v1041_v30 = vpop.f32.mrf.mxu1 }
 0x1a1   :  { %1338 = vst.msk [vmem:[%s2686_s5 + $0x38] sm:$0xff] %vm1330_vm2, %v1047_v29  ;;  %v1042_v31 = vadd.f32 %v2359_v16, %v1041_v30 }
 0x1a2   :  { %v1803_v32 = vpop.f32.mrf.mxu1 }
 0x1a3   :  { %1337 = vst.msk [vmem:[%s2686_s5 + $0x30] sm:$0xff] %vm1330_vm2, %v1042_v31  ;;  %v1057_v33 = vadd.f32 %v1803_v32, %v2359_v16 }
 0x1a4   :  { %v1051_v34 = vpop.f32.mrf.mxu1 }
 0x1a5   :  { %1340 = vst.msk [vmem:[%s2686_s5 + $0x48] sm:$0xff] %vm1330_vm2, %v1057_v33  ;;  %v1052_v35 = vadd.f32 %v2359_v16, %v1051_v34 }
 0x1a6   :  { %v1806_v36 = vpop.f32.mrf.mxu1 }
 0x1a7   :  { %1339 = vst.msk [vmem:[%s2686_s5 + $0x40] sm:$0xff] %vm1330_vm2, %v1052_v35  ;;  %v1067_v37 = vadd.f32 %v1806_v36, %v2359_v16 }
 0x1a8   :  { %v1061_v38 = vpop.f32.mrf.mxu1 }
 0x1a9   :  { %1342 = vst.msk [vmem:[%s2686_s5 + $0x58] sm:$0xff] %vm1330_vm2, %v1067_v37  ;;  %v1062_v39 = vadd.f32 %v2359_v16, %v1061_v38 }
 0x1aa   :  { %v1809_v40 = vpop.f32.mrf.mxu1 }
 0x1ab   :  { %1341 = vst.msk [vmem:[%s2686_s5 + $0x50] sm:$0xff] %vm1330_vm2, %v1062_v39  ;;  %v1077_v41 = vadd.f32 %v1809_v40, %v2359_v16 }
 0x1ac   :  { %v1071_v42 = vpop.f32.mrf.mxu1 }
 0x1ad   :  { %1344 = vst.msk [vmem:[%s2686_s5 + $0x68] sm:$0xff] %vm1330_vm2, %v1077_v41  ;;  %v1072_v43 = vadd.f32 %v2359_v16, %v1071_v42 }
 0x1ae   :  { %v1812_v44 = vpop.f32.mrf.mxu1 }
 0x1af   :  { %1343 = vst.msk [vmem:[%s2686_s5 + $0x60] sm:$0xff] %vm1330_vm2, %v1072_v43  ;;  %v1087_v45 = vadd.f32 %v1812_v44, %v2359_v16 }
 0x1b0   :  { %v1081_v46 = vpop.f32.mrf.mxu1 }
 0x1b1   :  { %1346 = vst.msk [vmem:[%s2686_s5 + $0x78] sm:$0xff] %vm1330_vm2, %v1087_v45  ;;  %v1082_v47 = vadd.f32 %v2359_v16, %v1081_v46 }
 0x1b2   :  { %v1815_v48 = vpop.f32.mrf.mxu1 }
 0x1b3   :  { %1345 = vst.msk [vmem:[%s2686_s5 + $0x70] sm:$0xff] %vm1330_vm2, %v1082_v47  ;;  %v1097_v49 = vadd.f32 %v1815_v48, %v2359_v16 }
 0x1b4   :  { %v1091_v50 = vpop.f32.mrf.mxu1 }
 0x1b5   :  { %1348 = vst.msk [vmem:[%s2686_s5 + $0x88] sm:$0xff] %vm1330_vm2, %v1097_v49  ;;  %v1092_v51 = vadd.f32 %v2359_v16, %v1091_v50 }
 0x1b6   :  { %v1818_v52 = vpop.f32.mrf.mxu1 }
 0x1b7   :  { %1347 = vst.msk [vmem:[%s2686_s5 + $0x80] sm:$0xff] %vm1330_vm2, %v1092_v51  ;;  %v1107_v53 = vadd.f32 %v1818_v52, %v2359_v16 }
 0x1b8   :  { %v1101_v54 = vpop.f32.mrf.mxu1 }
 0x1b9   :  { %1350 = vst.msk [vmem:[%s2686_s5 + $0x98] sm:$0xff] %vm1330_vm2, %v1107_v53  ;;  %v1102_v55 = vadd.f32 %v2359_v16, %v1101_v54 }
 0x1ba   :  { %v1821_v56 = vpop.f32.mrf.mxu1 }
 0x1bb   :  { %1349 = vst.msk [vmem:[%s2686_s5 + $0x90] sm:$0xff] %vm1330_vm2, %v1102_v55  ;;  %v1117_v57 = vadd.f32 %v1821_v56, %v2359_v16 }
 0x1bc   :  { %v1111_v58 = vpop.f32.mrf.mxu1 }
 0x1bd   :  { %1352 = vst.msk [vmem:[%s2686_s5 + $0xa8] sm:$0xff] %vm1330_vm2, %v1117_v57  ;;  %v1112_v59 = vadd.f32 %v2359_v16, %v1111_v58 }
 0x1be   :  { %v1824_v60 = vpop.f32.mrf.mxu1 }
 0x1bf   :  { %1351 = vst.msk [vmem:[%s2686_s5 + $0xa0] sm:$0xff] %vm1330_vm2, %v1112_v59  ;;  %v1127_v61 = vadd.f32 %v1824_v60, %v2359_v16 }
 0x1c0   :  { %v1121_v62 = vpop.f32.mrf.mxu1 }
 0x1c1   :  { %1354 = vst.msk [vmem:[%s2686_s5 + $0xb8] sm:$0xff] %vm1330_vm2, %v1127_v61  ;;  %v1122_v63 = vadd.f32 %v2359_v16, %v1121_v62 }
 0x1c2   :  { %v1827_v0 = vpop.f32.mrf.mxu1 }
 0x1c3   :  { %1353 = vst.msk [vmem:[%s2686_s5 + $0xb0] sm:$0xff] %vm1330_vm2, %v1122_v63  ;;  %v1137_v1 = vadd.f32 %v1827_v0, %v2359_v16 }
 0x1c4   :  { %v1131_v2 = vpop.f32.mrf.mxu1 }
 0x1c5   :  { %1356 = vst.msk [vmem:[%s2686_s5 + $0xc8] sm:$0xff] %vm1330_vm2, %v1137_v1  ;;  %v1132_v3 = vadd.f32 %v2359_v16, %v1131_v2 }
 0x1c6   :  { %v1830_v4 = vpop.f32.mrf.mxu1 }
 0x1c7   :  { %1355 = vst.msk [vmem:[%s2686_s5 + $0xc0] sm:$0xff] %vm1330_vm2, %v1132_v3  ;;  %v1147_v5 = vadd.f32 %v1830_v4, %v2359_v16 }
 0x1c8   :  { %v1141_v6 = vpop.f32.mrf.mxu1 }
 0x1c9   :  { %1358 = vst.msk [vmem:[%s2686_s5 + $0xd8] sm:$0xff] %vm1330_vm2, %v1147_v5  ;;  %v1142_v7 = vadd.f32 %v2359_v16, %v1141_v6 }
 0x1ca   :  { %v1833_v8 = vpop.f32.mrf.mxu1 }
 0x1cb   :  { %1357 = vst.msk [vmem:[%s2686_s5 + $0xd0] sm:$0xff] %vm1330_vm2, %v1142_v7  ;;  %v1157_v9 = vadd.f32 %v1833_v8, %v2359_v16 }
 0x1cc   :  { %v1151_v10 = vpop.f32.mrf.mxu1 }
 0x1cd   :  { %1360 = vst.msk [vmem:[%s2686_s5 + $0xe8] sm:$0xff] %vm1330_vm2, %v1157_v9  ;;  %v1152_v11 = vadd.f32 %v2359_v16, %v1151_v10 }
 0x1ce   :  { %v1836_v13 = vpop.f32.mrf.mxu1 }
 0x1cf   :  { %1359 = vst.msk [vmem:[%s2686_s5 + $0xe0] sm:$0xff] %vm1330_vm2, %v1152_v11  ;;  %v1167_v14 = vadd.f32 %v1836_v13, %v2359_v16 }
 0x1d0   :  { %v1161_v15 = vpop.f32.mrf.mxu1 }
 0x1d1   :  { %1362 = vst.msk [vmem:[%s2686_s5 + $0xf8] sm:$0xff] %vm1330_vm2, %v1167_v14  ;;  %v1162_v17 = vadd.f32 %v2359_v16, %v1161_v15 }
 0x1d2   :  { %v1839_v18 = vpop.f32.mrf.mxu1 }
 0x1d3   :  { %1361 = vst.msk [vmem:[%s2686_s5 + $0xf0] sm:$0xff] %vm1330_vm2, %v1162_v17  ;;  %v1177_v12 = vadd.f32 %v1839_v18, %v2359_v16 }
 0x1d4   :  { %v1171_v19 = vpop.f32.mrf.mxu1 }
 0x1d5   :  { %1364 = vst.msk [vmem:[%s2686_s5 + $0x108] sm:$0xff] %vm1330_vm2, %v1177_v12  ;;  %v1172_v20 = vadd.f32 %v2359_v16, %v1171_v19 }
 0x1d6   :  { %v1842_v21 = vpop.f32.mrf.mxu1 }
 0x1d7   :  { %1363 = vst.msk [vmem:[%s2686_s5 + $0x100] sm:$0xff] %vm1330_vm2, %v1172_v20  ;;  %v1187_v22 = vadd.f32 %v1842_v21, %v2359_v16 }
 0x1d8   :  { %v1181_v23 = vpop.f32.mrf.mxu1 }
 0x1d9   :  { %1366 = vst.msk [vmem:[%s2686_s5 + $0x118] sm:$0xff] %vm1330_vm2, %v1187_v22  ;;  %v1182_v24 = vadd.f32 %v2359_v16, %v1181_v23 }
 0x1da   :  { %v1845_v25 = vpop.f32.mrf.mxu1 }
 0x1db   :  { %1365 = vst.msk [vmem:[%s2686_s5 + $0x110] sm:$0xff] %vm1330_vm2, %v1182_v24  ;;  %v1197_v26 = vadd.f32 %v1845_v25, %v2359_v16 }
 0x1dc   :  { %v1191_v27 = vpop.f32.mrf.mxu1 }
 0x1dd   :  { %1368 = vst.msk [vmem:[%s2686_s5 + $0x128] sm:$0xff] %vm1330_vm2, %v1197_v26  ;;  %v1192_v28 = vadd.f32 %v2359_v16, %v1191_v27 }
 0x1de   :  { %v1848_v29 = vpop.f32.mrf.mxu1 }
 0x1df   :  { %1367 = vst.msk [vmem:[%s2686_s5 + $0x120] sm:$0xff] %vm1330_vm2, %v1192_v28  ;;  %v1207_v30 = vadd.f32 %v1848_v29, %v2359_v16 }
 0x1e0   :  { %v1201_v31 = vpop.f32.mrf.mxu1 }
 0x1e1   :  { %1370 = vst.msk [vmem:[%s2686_s5 + $0x138] sm:$0xff] %vm1330_vm2, %v1207_v30  ;;  %v1202_v32 = vadd.f32 %v2359_v16, %v1201_v31 }
 0x1e2   :  { %v1851_v33 = vpop.f32.mrf.mxu1 }
 0x1e3   :  { %1369 = vst.msk [vmem:[%s2686_s5 + $0x130] sm:$0xff] %vm1330_vm2, %v1202_v32  ;;  %v1217_v34 = vadd.f32 %v1851_v33, %v2359_v16 }
 0x1e4   :  { %v1211_v35 = vpop.f32.mrf.mxu1 }
 0x1e5   :  { %1372 = vst.msk [vmem:[%s2686_s5 + $0x148] sm:$0xff] %vm1330_vm2, %v1217_v34  ;;  %v1212_v36 = vadd.f32 %v2359_v16, %v1211_v35 }
 0x1e6   :  { %v1854_v37 = vpop.f32.mrf.mxu1 }
 0x1e7   :  { %1371 = vst.msk [vmem:[%s2686_s5 + $0x140] sm:$0xff] %vm1330_vm2, %v1212_v36  ;;  %v1227_v38 = vadd.f32 %v1854_v37, %v2359_v16 }
 0x1e8   :  { %v1221_v39 = vpop.f32.mrf.mxu1 }
 0x1e9   :  { %1374 = vst.msk [vmem:[%s2686_s5 + $0x158] sm:$0xff] %vm1330_vm2, %v1227_v38  ;;  %v1222_v40 = vadd.f32 %v2359_v16, %v1221_v39 }
 0x1ea   :  { %v1857_v41 = vpop.f32.mrf.mxu1 }
 0x1eb   :  { %1373 = vst.msk [vmem:[%s2686_s5 + $0x150] sm:$0xff] %vm1330_vm2, %v1222_v40  ;;  %v1237_v42 = vadd.f32 %v1857_v41, %v2359_v16 }
 0x1ec   :  { %v1231_v43 = vpop.f32.mrf.mxu1 }
 0x1ed   :  { %1376 = vst.msk [vmem:[%s2686_s5 + $0x168] sm:$0xff] %vm1330_vm2, %v1237_v42  ;;  %v1232_v44 = vadd.f32 %v2359_v16, %v1231_v43 }
 0x1ee   :  { %v1860_v45 = vpop.f32.mrf.mxu1 }
 0x1ef   :  { %1375 = vst.msk [vmem:[%s2686_s5 + $0x160] sm:$0xff] %vm1330_vm2, %v1232_v44  ;;  %v1247_v46 = vadd.f32 %v1860_v45, %v2359_v16 }
 0x1f0   :  { %v1241_v47 = vpop.f32.mrf.mxu1 }
 0x1f1   :  { %1378 = vst.msk [vmem:[%s2686_s5 + $0x178] sm:$0xff] %vm1330_vm2, %v1247_v46  ;;  %v1242_v48 = vadd.f32 %v2359_v16, %v1241_v47 }
 0x1f2   :  { %v1863_v49 = vpop.f32.mrf.mxu1 }
 0x1f3   :  { %1377 = vst.msk [vmem:[%s2686_s5 + $0x170] sm:$0xff] %vm1330_vm2, %v1242_v48  ;;  %v1257_v50 = vadd.f32 %v1863_v49, %v2359_v16 }
 0x1f4   :  { %v1251_v51 = vpop.f32.mrf.mxu1 }
 0x1f5   :  { %1380 = vst.msk [vmem:[%s2686_s5 + $0x188] sm:$0xff] %vm1330_vm2, %v1257_v50  ;;  %v1252_v52 = vadd.f32 %v2359_v16, %v1251_v51 }
 0x1f6   :  { %v1866_v53 = vpop.f32.mrf.mxu1 }
 0x1f7   :  { %1379 = vst.msk [vmem:[%s2686_s5 + $0x180] sm:$0xff] %vm1330_vm2, %v1252_v52  ;;  %v1267_v54 = vadd.f32 %v1866_v53, %v2359_v16 }
 0x1f8   :  { %v1261_v55 = vpop.f32.mrf.mxu1 }
 0x1f9   :  { %1382 = vst.msk [vmem:[%s2686_s5 + $0x198] sm:$0xff] %vm1330_vm2, %v1267_v54  ;;  %v1262_v56 = vadd.f32 %v2359_v16, %v1261_v55 }
 0x1fa   :  { %v1869_v57 = vpop.f32.mrf.mxu1 }
 0x1fb   :  { %1381 = vst.msk [vmem:[%s2686_s5 + $0x190] sm:$0xff] %vm1330_vm2, %v1262_v56  ;;  %v1277_v58 = vadd.f32 %v1869_v57, %v2359_v16 }
 0x1fc   :  { %v1271_v59 = vpop.f32.mrf.mxu1 }
 0x1fd   :  { %1384 = vst.msk [vmem:[%s2686_s5 + $0x1a8] sm:$0xff] %vm1330_vm2, %v1277_v58  ;;  %v1272_v60 = vadd.f32 %v2359_v16, %v1271_v59 }
 0x1fe   :  { %v1872_v61 = vpop.f32.mrf.mxu1 }
 0x1ff   :  { %1383 = vst.msk [vmem:[%s2686_s5 + $0x1a0] sm:$0xff] %vm1330_vm2, %v1272_v60  ;;  %v1287_v62 = vadd.f32 %v1872_v61, %v2359_v16 }
 0x200   :  { %v1281_v63 = vpop.f32.mrf.mxu1 }
 0x201   :  { %1386 = vst.msk [vmem:[%s2686_s5 + $0x1b8] sm:$0xff] %vm1330_vm2, %v1287_v62  ;;  %v1282_v0 = vadd.f32 %v2359_v16, %v1281_v63 }
 0x202   :  { %v1875_v1 = vpop.f32.mrf.mxu1 }
 0x203   :  { %1385 = vst.msk [vmem:[%s2686_s5 + $0x1b0] sm:$0xff] %vm1330_vm2, %v1282_v0  ;;  %v1297_v2 = vadd.f32 %v1875_v1, %v2359_v16 }
 0x204   :  { %v1291_v3 = vpop.f32.mrf.mxu1 }
 0x205   :  { %1388 = vst.msk [vmem:[%s2686_s5 + $0x1c8] sm:$0xff] %vm1330_vm2, %v1297_v2  ;;  %v1292_v4 = vadd.f32 %v2359_v16, %v1291_v3 }
 0x206   :  { %v1878_v5 = vpop.f32.mrf.mxu1 }
 0x207   :  { %1387 = vst.msk [vmem:[%s2686_s5 + $0x1c0] sm:$0xff] %vm1330_vm2, %v1292_v4  ;;  %v1307_v6 = vadd.f32 %v1878_v5, %v2359_v16 }
 0x208   :  { %v1301_v7 = vpop.f32.mrf.mxu1 }
 0x209   :  { %1390 = vst.msk [vmem:[%s2686_s5 + $0x1d8] sm:$0xff] %vm1330_vm2, %v1307_v6  ;;  %v1302_v8 = vadd.f32 %v2359_v16, %v1301_v7 }
 0x20a   :  { %v1881_v9 = vpop.f32.mrf.mxu1 }
 0x20b   :  { %1389 = vst.msk [vmem:[%s2686_s5 + $0x1d0] sm:$0xff] %vm1330_vm2, %v1302_v8  ;;  %v1317_v10 = vadd.f32 %v1881_v9, %v2359_v16 }
 0x20c   :  { %v1311_v11 = vpop.f32.mrf.mxu1 }
 0x20d   :  { %1392 = vst.msk [vmem:[%s2686_s5 + $0x1e8] sm:$0xff] %vm1330_vm2, %v1317_v10  ;;  %v1312_v13 = vadd.f32 %v2359_v16, %v1311_v11 }
 0x20e   :  { %v1884_v14 = vpop.f32.mrf.mxu1 }
 0x20f   :  { %1391 = vst.msk [vmem:[%s2686_s5 + $0x1e0] sm:$0xff] %vm1330_vm2, %v1312_v13  ;;  %v1327_v15 = vadd.f32 %v1884_v14, %v2359_v16 }
 0x210   :  { %v1321_v17 = vpop.f32.mrf.mxu1 }
 0x211   :  { %1394 = vst.msk [vmem:[%s2686_s5 + $0x1f8] sm:$0xff] %vm1330_vm2, %v1327_v15  ;;  %v1322_v18 = vadd.f32 %v2359_v16, %v1321_v17 }
 0x213   :  { %1393 = vst.msk [vmem:[%s2686_s5 + $0x1f0] sm:$0xff] %vm1330_vm2, %v1322_v18 }

</bundles_post_ra>
